<compile_context>
chip_gen: v5e
topology: v5e:2x2
jax: 0.10.0
libtpu: 0.0.40
codegen_flags: <defaults>
</compile_context>

<pallas_src>
import jax
import jax.numpy as jnp
from jax.experimental import pallas as pl
from jax.experimental.pallas import tpu as pltpu


def _linear_kernel(w_ref, x_ref, o_ref):
    # w_ref : (2,)       f32 in SMEM  (the two weights, scalar path)
    # x_ref : (2, R, C)  f32 in VMEM  (feature-major, sublane/lane-dense)
    # o_ref : (R, C)     f32 in VMEM  (dense output block, unmasked stores)
    w0 = w_ref[0]
    w1 = w_ref[1]
    o_ref[...] = x_ref[0] * w0 + x_ref[1] * w1


def linear_forward(
    x: jax.Array,
    w: jax.Array,
    *,
    block_rows: int = 2048,   # sublane rows per grid step (multiple of 8)
    block_cols: int = 512,    # lanes per row (multiple of 128)
) -> jax.Array:
    """Computes x @ w with a Pallas TPU kernel. x: (..., 2), w: (2, 1) -> (..., 1)."""
    assert w.shape == (2, 1), "Linear module expects W of shape (2, 1)"
    assert x.shape[-1] == 2, "Linear module expects inputs with last dim 2"
    assert block_rows % 8 == 0 and block_cols % 128 == 0

    out_dtype = jnp.promote_types(x.dtype, w.dtype)
    lead_shape = x.shape[:-1]
    x2d = x.reshape(-1, 2)
    n = x2d.shape[0]

    c = block_cols
    # Pad rows only up to the next multiple of C (<= C-1 rows); this pad, the
    # f32 cast and the feature-major transpose fuse into one XLA copy pass.
    n_pad = pl.cdiv(n, c) * c
    xf = x2d.astype(jnp.float32)
    if n_pad != n:
        xf = jnp.pad(xf, ((0, n_pad - n), (0, 0)))
    nr = n_pad // c
    # Feature-major + dense tiling layout: (n_pad, 2) -> (2, n_pad) -> (2, nr, C).
    # The reshape is free (contiguous); each kernel block is a contiguous
    # R*C*4-byte HBM chunk per feature.
    xt = xf.T.reshape(2, nr, c)

    # Ragged grid over the row-block axis; shrink the block if the whole
    # problem fits in a single step.
    r = block_rows if nr > block_rows else nr
    grid = (pl.cdiv(nr, r),)

    w_flat = w.astype(jnp.float32).reshape(2)  # two scalars for SMEM

    out = pl.pallas_call(
        _linear_kernel,
        out_shape=jax.ShapeDtypeStruct((nr, c), jnp.float32),
        grid=grid,
        in_specs=[
            pl.BlockSpec(memory_space=pltpu.MemorySpace.SMEM),     # W scalars
            pl.BlockSpec((2, r, c), lambda i: (0, i, 0)),          # dense X slab
        ],
        out_specs=pl.BlockSpec((r, c), lambda i: (i, 0)),          # dense output slab
        compiler_params=pltpu.CompilerParams(
            dimension_semantics=("parallel",),       # shard row blocks across TCs
            vmem_limit_bytes=32 * 1024 * 1024,       # explicit (v5e default is 16 MiB)
        ),
        cost_estimate=pl.CostEstimate(
            flops=3 * n, transcendentals=0, bytes_accessed=12 * n),
    )(w_flat, xt)

    # out[i, j] is the result for flat sample i*C + j -> contiguous reshape,
    # then drop the padded tail and restore torch.matmul's output layout.
    result = out.reshape(n_pad, 1)[:n]
    return result.astype(out_dtype).reshape(*lead_shape, 1)


if __name__ == "__main__":
    key = jax.random.PRNGKey(0)
    kx, kw, kx2 = jax.random.split(key, 3)

    # Module implies inputs with last dim 2 (W is (2, 1)); small batch N=8.
    N, K, M = 8, 2, 1
    x = jax.random.normal(kx, (N, K), dtype=jnp.float32)
    W = jax.random.normal(kw, (K, M), dtype=jnp.float32)  # stand-in for torch.randn((2,1))

    out = linear_forward(x, W)
    jax.block_until_ready(out)
    ref = x @ W
    assert out.shape == (N, M)
    assert jnp.allclose(out, ref, atol=1e-5, rtol=1e-5)

    # Second check: multi-step ragged grid (small blocks so the data stays tiny)
    # exercises the same code path used for large N with the default tile sizes.
    N2 = 4100
    x2 = jax.random.normal(kx2, (N2, K), dtype=jnp.float32)
    out2 = linear_forward(x2, W, block_rows=8, block_cols=128)
    jax.block_until_ready(out2)
    ref2 = x2 @ W
    assert out2.shape == (N2, M)
    assert jnp.allclose(out2, ref2, atol=1e-5, rtol=1e-5)

    print("KERNEL_OK")
</pallas_src>

<mosaic_0001>
module attributes {stable_mosaic.version = 11 : i64} {
  func.func @_linear_kernel(%arg0: i32, %arg1: memref<2xf32, #tpu.memory_space<smem>>, %arg2: memref<2x1x512xf32, #tpu.memory_space<vmem>>, %arg3: memref<1x512xf32, #tpu.memory_space<vmem>>) attributes {dimension_semantics = [#tpu.dimension_semantics<parallel>], iteration_bounds = array<i64: 1>, scalar_prefetch = 0 : i64, scratch_operands = 0 : i64, tpu.core_type = #tpu.core_type<tc>, window_params = [{transform_indices = @transform_0, window_bounds = array<i64: 2>}, {transform_indices = @transform_1, window_bounds = array<i64: 2, 1, 512>}, {transform_indices = @transform_2, window_bounds = array<i64: 1, 512>}]} {
    %c0 = arith.constant 0 : index
    %0 = memref.load %arg1[%c0] : memref<2xf32, #tpu.memory_space<smem>>
    %c1 = arith.constant 1 : index
    %1 = memref.load %arg1[%c1] : memref<2xf32, #tpu.memory_space<smem>>
    %c0_0 = arith.constant 0 : index
    %c0_1 = arith.constant 0 : index
    %c0_2 = arith.constant 0 : index
    %2 = vector.load %arg2[%c0_0, %c0_1, %c0_2] : memref<2x1x512xf32, #tpu.memory_space<vmem>>, vector<1x1x512xf32>
    %3 = vector.shape_cast %2 : vector<1x1x512xf32> to vector<1x512xf32>
    %4 = vector.broadcast %0 : f32 to vector<1x512xf32>
    %5 = arith.mulf %3, %4 : vector<1x512xf32>
    %c1_3 = arith.constant 1 : index
    %c0_4 = arith.constant 0 : index
    %c0_5 = arith.constant 0 : index
    %6 = vector.load %arg2[%c1_3, %c0_4, %c0_5] : memref<2x1x512xf32, #tpu.memory_space<vmem>>, vector<1x1x512xf32>
    %7 = vector.shape_cast %6 : vector<1x1x512xf32> to vector<1x512xf32>
    %8 = vector.broadcast %1 : f32 to vector<1x512xf32>
    %9 = arith.mulf %7, %8 : vector<1x512xf32>
    %10 = arith.addf %5, %9 : vector<1x512xf32>
    %c0_6 = arith.constant 0 : index
    %c0_7 = arith.constant 0 : index
    %11 = vector.load %arg3[%c0_6, %c0_7] : memref<1x512xf32, #tpu.memory_space<vmem>>, vector<1x512xf32>
    tpu.vector_store %arg3[%c0_6, %c0_7], %10 {strides = array<i32>} : memref<1x512xf32, #tpu.memory_space<vmem>>, vector<1x512xf32>,
    return
  }
  func.func @transform_0(%arg0: i32) -> i32 {
    %c0_i32 = arith.constant 0 : i32
    %c0_i32_0 = arith.constant 0 : i32
    return %c0_i32 : i32
  }
  func.func @transform_1(%arg0: i32) -> (i32, i32, i32) {
    %c0_i32 = arith.constant 0 : i32
    %c0_i32_0 = arith.constant 0 : i32
    %c0_i32_1 = arith.constant 0 : i32
    return %c0_i32, %arg0, %c0_i32_0 : i32, i32, i32
  }
  func.func @transform_2(%arg0: i32) -> (i32, i32) {
    %c0_i32 = arith.constant 0 : i32
    %c0_i32_0 = arith.constant 0 : i32
    return %arg0, %c0_i32 : i32, i32
  }
}

</mosaic_0001>

<bundles_post_ra>
// kernel: tpu_custom_call.1
= control target key start
LH: loop header
LB: loop body
LE: loop exit
PB: predicated region body
PF: predicated region fallthrough
CT: control target
= control target key end

     0   :  { %7 = vsyncpa [#allocation5], 0  ;;  %s175_s0 = inlined_call_operand.hbm [shape: f32[2], index: 0, kind: input, shape index: {}]   ;;  %s176_s1 = inlined_call_operand.hbm [shape: f32[2,1,512], index: 1, kind: input, shape index: {}]   ;;  %s177_s2 = inlined_call_operand.hbm [shape: f32[1,512], index: 2, kind: output, shape index: {}]  }
   0x1   :  { %8 = vsyncpa [#allocation3], 0 }
   0x2   :  { %9 = vsyncpa [#allocation4], 0  ;;  %s15_s11 = sshll.u32 %s175_s0, 4  ;;  %s23_s14 = sshll.u32 %s176_s1, 4  ;;  %s16_s11 = int_to_ptr.hbm [resolvable:$true] %s15_s11  ;;  %s24_s14 = int_to_ptr.hbm [resolvable:$true] %s23_s14 }
   0x3   :  { %s146_s15 = smov [#allocation2]   ;;  %s147_s16 = smov [#allocation6]  }
   0x4   :  { %18 = dma.hbm_to_smem %s16_s11, 16, %s146_s15, [#allocation5]  }
   0x5   :  { %s25_s17 = sshll.u32 %s147_s16, 4  ;;  %s148_s18 = smov 64   ;;  %s26_s17 = int_to_ptr.vmem [resolvable:$true] %s25_s17 }
   0x6   :  { %s149_s19 = smov 4  }
   0x7   :  { %31 = dma.hbm_to_vmem [thread:$0]  %s24_s14, 128, %s26_s17, [#allocation3], %s148_s18, %s148_s18, %s149_s19  }
   0x8   :  { %140 = dma.done.wait [#allocation5], 16  }
   0x9   :  { %141 = vsyncadd [#allocation5], 4294967280 }
   0xa   :  { %142 = dma.done.wait [#allocation3], 128  }
   0xb   :  { %143 = vsyncadd [#allocation3], 4294967168 }
   0xc   :  { %40 = sfence }
   0xd   :  { %s41_s0 = sld [smem:[#allocation2]]  ;;  %v43_v0 = vld [vmem:[#allocation6] sm:$0xf]  ;;  %v47_v1 = vld [vmem:[#allocation6 + $0x4] sm:$0xf]  ;;  %v51_v2 = vlaneseq  ;;  %s150_s1 = smov [#allocation7]  }
   0xe   :  { %s74_s20 = sld [smem:[#allocation2 + $0x1]]  ;;  %s61_s21 = sshll.u32 %s150_s1, 4  ;;  %s62_s21 = int_to_ptr.vmem [resolvable:$true] %s61_s21 }
   0xf   :  { %s63_s24 = sshll.u32 %s177_s2, 4  ;;  %vm53_vm0 = vcmp.lt.s32.totalorder %v51_v2, 512  ;;  %s64_s24 = int_to_ptr.hbm [resolvable:$true] %s63_s24 }
  0x13   :  { %v44_v3 = vstv %s41_s0 }
  0x14   :  { %v45_v4 = vmul.f32 %v44_v3, %v43_v0  ;;  %v48_v5 = vstv %s74_s20 }
  0x15   :  { %v49_v6 = vmul.f32 %v48_v5, %v47_v1 }
  0x17   :  { %v50_v7 = vadd.f32 %v49_v6, %v45_v4 }
  0x19   :  { %55 = vst.msk [vmem:[#allocation7] sm:$0xf] %vm53_vm0, %v50_v7 }
  0x1a   :  { %66 = dma.vmem_to_hbm [thread:$0]  %s62_s21, 64, %s64_s24, [#allocation4]  }
  0x1b   :  { %144 = dma.done.wait [#allocation4], 64  }
  0x1c   :  { %145 = vsyncadd [#allocation4], 4294967232 }
  0x1d   :  { %71 = vsyncpa [#allocation3], 1 }
  0x1e   :  { %72 = vsyncpa [#allocation4], 1 }
  0x1f   :  { %73 = vsyncpa [#allocation5], 1 }

</bundles_post_ra>
